<compile_context>
chip_gen: v5e
topology: v5e:2x2
jax: 0.10.0
libtpu: 0.0.40
codegen_flags: <defaults>
</compile_context>

<pallas_src>
import functools

import jax
import jax.numpy as jnp
from jax import lax
from jax.experimental import pallas as pl
from jax.experimental.pallas import tpu as pltpu

IN_DIM, H1_DIM, H2_DIM = 26, 64, 32


def _round_up(n, m):
    return ((n + m - 1) // m) * m


def _mlp_kernel(x_ref, w1_ref, b1_ref, w2_ref, b2_ref, w3_ref, b3_ref, o_ref):
    # x_ref:  [TB, 26] f32 (raw input rows)
    # w1_ref: [64, 26] bf16   b1_ref: [64, 1] f32
    # w2_ref: [32, 64] bf16   b2_ref: [32, 1] f32
    # w3_ref: [32, 1]  f32    b3_ref: [1, 1]  f32
    # o_ref:  [1, TB]  f32 (lane-dense output slab)
    x = x_ref[...].astype(jnp.bfloat16)              # cast only at the MXU input
    # h1 = W1 @ x^T -> [64, TB]; contraction over K=26.  Mosaic performs the
    # operand transpose on the (otherwise idle) XLU; the batch rides the
    # 128-lane axis of every downstream tensor.
    h1 = lax.dot_general(w1_ref[...], x,
                         dimension_numbers=(((1,), (1,)), ((), ())),
                         preferred_element_type=jnp.float32)
    # Bias + ReLU in f32 (v5e VPU has no bf16 path); only the post-ReLU bf16
    # tensor is materialized for the next matmul.
    # TODO(synk): dropout(p=0.2) is identity (eval semantics); training-mode
    # parity would need pltpu.prng_seed/prng_random_bits masks + 1/(1-p) scale.
    h1 = jnp.maximum(h1 + b1_ref[...], 0.0).astype(jnp.bfloat16)     # [64, TB]
    h2 = jnp.dot(w2_ref[...], h1, preferred_element_type=jnp.float32)
    h2 = jnp.maximum(h2 + b2_ref[...], 0.0)                          # [32, TB] f32
    # 32 -> 1 head: VPU broadcast-mul + sublane (XLU) reduce + EUP sigmoid.
    # (Never a 1-wide MXU tile; store stays lane-dense.)
    logits = jnp.sum(h2 * w3_ref[...], axis=0, keepdims=True) + b3_ref[...]
    o_ref[...] = jax.nn.sigmoid(logits)                              # [1, TB]


@functools.partial(jax.jit, static_argnames=("tile_b",))
def dyslexia_forward(x, w1, b1, w2, b2, w3, b3, *, tile_b=8192):
    """x: [B, 26] f32; params in PyTorch layout (w: [out, in], b: [out]).
    Returns sigmoid probabilities [B, 1] f32."""
    B = x.shape[0]
    if B == 0:                                    # degenerate-batch guard
        return jnp.zeros((0, 1), jnp.float32)

    # --- tile selection -----------------------------------------------------
    # Large tiles amortize the ~0.35us per-grid-step overhead.  Once the batch
    # is large enough, cap the tile so there are >= 4 grid steps (keeps both
    # v7x TensorCores busy under "parallel" semantics and the pipeline live),
    # but never shrink a step below 2048 lanes.
    tile_b = min(tile_b, _round_up(B, 128))
    if B >= 4 * 2048:
        tile_b = max(2048, min(tile_b, _round_up(pl.cdiv(B, 4), 128)))
    n_tiles = pl.cdiv(B, tile_b)
    b_pad = n_tiles * tile_b

    bf16 = jnp.bfloat16
    # x streams in its native layout: only the batch dim is zero-padded (no
    # transpose / cast HBM pass over x in the wrapper).
    x_p = jnp.pad(x.astype(jnp.float32), ((0, b_pad - B), (0, 0)))   # [b_pad, 26]
    w1b = w1.astype(bf16)                               # [64, 26]
    w2b = w2.astype(bf16)                               # [32, 64]
    b1c = b1.reshape(H1_DIM, 1).astype(jnp.float32)     # [64, 1]
    b2c = b2.reshape(H2_DIM, 1).astype(jnp.float32)     # [32, 1]
    w3c = w3.reshape(H2_DIM, 1).astype(jnp.float32)     # [32, 1]
    b3c = b3.reshape(1, 1).astype(jnp.float32)          # [1, 1]

    # Weights/biases: same block every step -> VMEM-resident, no re-DMA.
    resident = lambda a: pl.BlockSpec(a.shape, lambda i: (0, 0))

    # VMEM budget per batch column: double-buffered x block (26 lanes pad to
    # 128) + double-buffered out block + h1 (f32 acc + bf16) + h2 (f32) + misc.
    per_col = 2 * 128 * 4 + 2 * 4 + H1_DIM * (4 + 2) + H2_DIM * 4 + 32
    vmem_limit = int(max(32 << 20, min(48 << 20, 2 * tile_b * per_col)))

    param_bytes = ((w1b.size + w2b.size) * 2
                   + (b1c.size + b2c.size + w3c.size + b3c.size) * 4)
    cost = pl.CostEstimate(
        flops=2 * b_pad * (IN_DIM * H1_DIM + H1_DIM * H2_DIM + H2_DIM),
        transcendentals=b_pad,                           # one sigmoid per row
        bytes_accessed=b_pad * (IN_DIM * 4 + 4) + param_bytes,
    )

    out = pl.pallas_call(
        _mlp_kernel,
        out_shape=jax.ShapeDtypeStruct((1, b_pad), jnp.float32),
        grid=(n_tiles,),
        in_specs=[
            pl.BlockSpec((tile_b, IN_DIM), lambda i: (i, 0)),    # x streams
            resident(w1b), resident(b1c),
            resident(w2b), resident(b2c),
            resident(w3c), resident(b3c),
        ],
        out_specs=pl.BlockSpec((1, tile_b), lambda i: (0, i)),   # lane-dense
        compiler_params=pltpu.CompilerParams(
            dimension_semantics=("parallel",),
            vmem_limit_bytes=vmem_limit),
        cost_estimate=cost,
    )(x_p, w1b, b1c, w2b, b2c, w3c, b3c)

    return out[0, :B].reshape(B, 1)


def init_params(key):
    """PyTorch-style (uniform +/- 1/sqrt(fan_in)) init, PyTorch layouts."""
    def linear(k, fan_in, fan_out):
        kw, kb = jax.random.split(k)
        bound = 1.0 / jnp.sqrt(fan_in)
        w = jax.random.uniform(kw, (fan_out, fan_in), jnp.float32, -bound, bound)
        b = jax.random.uniform(kb, (fan_out,), jnp.float32, -bound, bound)
        return w, b

    k1, k2, k3 = jax.random.split(key, 3)
    w1, b1 = linear(k1, IN_DIM, H1_DIM)
    w2, b2 = linear(k2, H1_DIM, H2_DIM)
    w3, b3 = linear(k3, H2_DIM, 1)
    return w1, b1, w2, b2, w3, b3


def reference_forward(x, w1, b1, w2, b2, w3, b3, *, matmul_dtype=jnp.bfloat16):
    """Pure-JAX reference.  matmul_dtype=bfloat16 mirrors the kernel numerics
    (bf16 matmul inputs, f32 accumulation/elementwise); float32 gives the
    exact PyTorch-f32 semantics."""
    h1 = jnp.maximum(
        jnp.dot(x.astype(matmul_dtype), w1.T.astype(matmul_dtype),
                preferred_element_type=jnp.float32) + b1, 0.0)
    h2 = jnp.maximum(
        jnp.dot(h1.astype(matmul_dtype), w2.T.astype(matmul_dtype),
                preferred_element_type=jnp.float32) + b2, 0.0)
    logits = jnp.sum(h2 * w3.reshape(1, H2_DIM), axis=-1, keepdims=True) + b3
    return jax.nn.sigmoid(logits)


if __name__ == "__main__":
    key = jax.random.PRNGKey(0)
    k_params, k_x = jax.random.split(key)

    params = init_params(k_params)
    batch = 8
    x = jax.random.normal(k_x, (batch, IN_DIM), dtype=jnp.float32)

    out = jax.block_until_ready(dyslexia_forward(x, *params))
    assert out.shape == (batch, 1)

    ref_bf16 = reference_forward(x, *params)                            # kernel-numerics mirror
    ref_f32 = reference_forward(x, *params, matmul_dtype=jnp.float32)   # PyTorch-f32 semantics
    assert jnp.allclose(out, ref_bf16, atol=1e-3, rtol=1e-3), (
        float(jnp.max(jnp.abs(out - ref_bf16))))
    assert jnp.allclose(out, ref_f32, atol=3e-2, rtol=3e-2), (
        float(jnp.max(jnp.abs(out - ref_f32))))

    print("KERNEL_OK")
</pallas_src>

<mosaic_0001>
module attributes {stable_mosaic.version = 11 : i64} {
  func.func @_mlp_kernel(%arg0: i32, %arg1: memref<128x26xf32, #tpu.memory_space<vmem>>, %arg2: memref<64x26xbf16, #tpu.memory_space<vmem>>, %arg3: memref<64x1xf32, #tpu.memory_space<vmem>>, %arg4: memref<32x64xbf16, #tpu.memory_space<vmem>>, %arg5: memref<32x1xf32, #tpu.memory_space<vmem>>, %arg6: memref<32x1xf32, #tpu.memory_space<vmem>>, %arg7: memref<1x1xf32, #tpu.memory_space<vmem>>, %arg8: memref<1x128xf32, #tpu.memory_space<vmem>>) attributes {dimension_semantics = [#tpu.dimension_semantics<parallel>], iteration_bounds = array<i64: 1>, scalar_prefetch = 0 : i64, scratch_operands = 0 : i64, tpu.core_type = #tpu.core_type<tc>, window_params = [{transform_indices = @transform_0, window_bounds = array<i64: 128, 26>}, {pipeline_mode = #tpu.pipeline_mode<synchronous>, transform_indices = @transform_1, window_bounds = array<i64: 64, 26>}, {pipeline_mode = #tpu.pipeline_mode<synchronous>, transform_indices = @transform_2, window_bounds = array<i64: 64, 1>}, {pipeline_mode = #tpu.pipeline_mode<synchronous>, transform_indices = @transform_3, window_bounds = array<i64: 32, 64>}, {pipeline_mode = #tpu.pipeline_mode<synchronous>, transform_indices = @transform_4, window_bounds = array<i64: 32, 1>}, {pipeline_mode = #tpu.pipeline_mode<synchronous>, transform_indices = @transform_5, window_bounds = array<i64: 32, 1>}, {pipeline_mode = #tpu.pipeline_mode<synchronous>, transform_indices = @transform_6, window_bounds = array<i64: 1, 1>}, {transform_indices = @transform_7, window_bounds = array<i64: 1, 128>}]} {
    %c0 = arith.constant 0 : index
    %c0_0 = arith.constant 0 : index
    %0 = vector.load %arg1[%c0, %c0_0] : memref<128x26xf32, #tpu.memory_space<vmem>>, vector<128x26xf32>
    %1 = arith.truncf %0 : vector<128x26xf32> to vector<128x26xbf16>
    %c0_1 = arith.constant 0 : index
    %c0_2 = arith.constant 0 : index
    %2 = vector.load %arg2[%c0_1, %c0_2] : memref<64x26xbf16, #tpu.memory_space<vmem>>, vector<64x26xbf16>
    %cst = arith.constant dense<0.000000e+00> : vector<64x128xf32>
    %3 = tpu.matmul %2, %1, %cst {dimension_numbers = #tpu.dot_dimension_numbers<[1], [1], [0], [0], [0, 0, 1, 0], [], []>} : vector<64x26xbf16>, vector<128x26xbf16>, vector<64x128xf32> -> vector<64x128xf32>
    %c0_3 = arith.constant 0 : index
    %c0_4 = arith.constant 0 : index
    %4 = vector.load %arg3[%c0_3, %c0_4] : memref<64x1xf32, #tpu.memory_space<vmem>>, vector<64x1xf32>
    %5 = vector.broadcast %4 : vector<64x1xf32> to vector<64x128xf32>
    %6 = arith.addf %3, %5 : vector<64x128xf32>
    %cst_5 = arith.constant 0.000000e+00 : f32
    %7 = vector.broadcast %cst_5 : f32 to vector<64x128xf32>
    %8 = arith.maximumf %6, %7 : vector<64x128xf32>
    %9 = arith.truncf %8 : vector<64x128xf32> to vector<64x128xbf16>
    %c0_6 = arith.constant 0 : index
    %c0_7 = arith.constant 0 : index
    %10 = vector.load %arg4[%c0_6, %c0_7] : memref<32x64xbf16, #tpu.memory_space<vmem>>, vector<32x64xbf16>
    %cst_8 = arith.constant dense<0.000000e+00> : vector<32x128xf32>
    %11 = tpu.matmul %10, %9, %cst_8 {dimension_numbers = #tpu.dot_dimension_numbers<[1], [0], [0], [1], [0, 0, 1, 1], [], []>} : vector<32x64xbf16>, vector<64x128xbf16>, vector<32x128xf32> -> vector<32x128xf32>
    %c0_9 = arith.constant 0 : index
    %c0_10 = arith.constant 0 : index
    %12 = vector.load %arg5[%c0_9, %c0_10] : memref<32x1xf32, #tpu.memory_space<vmem>>, vector<32x1xf32>
    %13 = vector.broadcast %12 : vector<32x1xf32> to vector<32x128xf32>
    %14 = arith.addf %11, %13 : vector<32x128xf32>
    %cst_11 = arith.constant 0.000000e+00 : f32
    %15 = vector.broadcast %cst_11 : f32 to vector<32x128xf32>
    %16 = arith.maximumf %14, %15 : vector<32x128xf32>
    %c0_12 = arith.constant 0 : index
    %c0_13 = arith.constant 0 : index
    %17 = vector.load %arg6[%c0_12, %c0_13] : memref<32x1xf32, #tpu.memory_space<vmem>>, vector<32x1xf32>
    %18 = vector.broadcast %17 : vector<32x1xf32> to vector<32x128xf32>
    %19 = arith.mulf %16, %18 : vector<32x128xf32>
    %cst_14 = arith.constant dense<0.000000e+00> : vector<128xf32>
    %20 = vector.multi_reduction <add>, %19, %cst_14 [0] : vector<32x128xf32> to vector<128xf32>
    %21 = vector.shape_cast %20 : vector<128xf32> to vector<1x128xf32>
    %c0_15 = arith.constant 0 : index
    %c0_16 = arith.constant 0 : index
    %22 = vector.load %arg7[%c0_15, %c0_16] : memref<1x1xf32, #tpu.memory_space<vmem>>, vector<1x1xf32>
    %23 = vector.broadcast %22 : vector<1x1xf32> to vector<1x128xf32>
    %24 = arith.addf %21, %23 : vector<1x128xf32>
    %25 = arith.negf %24 : vector<1x128xf32>
    %26 = math.exp %25 : vector<1x128xf32>
    %cst_17 = arith.constant 1.000000e+00 : f32
    %27 = vector.broadcast %cst_17 : f32 to vector<1x128xf32>
    %28 = arith.addf %27, %26 : vector<1x128xf32>
    %29 = arith.divf %27, %28 : vector<1x128xf32>
    %c0_18 = arith.constant 0 : index
    %c0_19 = arith.constant 0 : index
    %30 = vector.load %arg8[%c0_18, %c0_19] : memref<1x128xf32, #tpu.memory_space<vmem>>, vector<1x128xf32>
    tpu.vector_store %arg8[%c0_18, %c0_19], %29 {strides = array<i32>} : memref<1x128xf32, #tpu.memory_space<vmem>>, vector<1x128xf32>,
    return
  }
  func.func @transform_0(%arg0: i32) -> (i32, i32) {
    %c0_i32 = arith.constant 0 : i32
    %c0_i32_0 = arith.constant 0 : i32
    return %arg0, %c0_i32 : i32, i32
  }
  func.func @transform_1(%arg0: i32) -> (i32, i32) {
    %c0_i32 = arith.constant 0 : i32
    %c0_i32_0 = arith.constant 0 : i32
    %c0_i32_1 = arith.constant 0 : i32
    return %c0_i32, %c0_i32_0 : i32, i32
  }
  func.func @transform_2(%arg0: i32) -> (i32, i32) {
    %c0_i32 = arith.constant 0 : i32
    %c0_i32_0 = arith.constant 0 : i32
    %c0_i32_1 = arith.constant 0 : i32
    return %c0_i32, %c0_i32_0 : i32, i32
  }
  func.func @transform_3(%arg0: i32) -> (i32, i32) {
    %c0_i32 = arith.constant 0 : i32
    %c0_i32_0 = arith.constant 0 : i32
    %c0_i32_1 = arith.constant 0 : i32
    return %c0_i32, %c0_i32_0 : i32, i32
  }
  func.func @transform_4(%arg0: i32) -> (i32, i32) {
    %c0_i32 = arith.constant 0 : i32
    %c0_i32_0 = arith.constant 0 : i32
    %c0_i32_1 = arith.constant 0 : i32
    return %c0_i32, %c0_i32_0 : i32, i32
  }
  func.func @transform_5(%arg0: i32) -> (i32, i32) {
    %c0_i32 = arith.constant 0 : i32
    %c0_i32_0 = arith.constant 0 : i32
    %c0_i32_1 = arith.constant 0 : i32
    return %c0_i32, %c0_i32_0 : i32, i32
  }
  func.func @transform_6(%arg0: i32) -> (i32, i32) {
    %c0_i32 = arith.constant 0 : i32
    %c0_i32_0 = arith.constant 0 : i32
    %c0_i32_1 = arith.constant 0 : i32
    return %c0_i32, %c0_i32_0 : i32, i32
  }
  func.func @transform_7(%arg0: i32) -> (i32, i32) {
    %c0_i32 = arith.constant 0 : i32
    %c0_i32_0 = arith.constant 0 : i32
    return %c0_i32, %arg0 : i32, i32
  }
}

</mosaic_0001>

<bundles_post_ra>
// kernel: dyslexia_forward.1
= control target key start
LH: loop header
LB: loop body
LE: loop exit
PB: predicated region body
PF: predicated region fallthrough
CT: control target
= control target key end

     0   :  { %vm129_vm0 = vcmask 211968   ;;  %v405_v16 = vmov 0   ;;  %vm245_vm1 = vcmask 523264   ;;  %s578_s0 = inlined_call_operand.vmem [shape: f32[128,26], index: 0, kind: input, shape index: {}]   ;;  %s579_s2 = inlined_call_operand.vmem [shape: f32[64,1], index: 2, kind: input, shape index: {}]   ;;  %s580_s4 = inlined_call_operand.vmem [shape: f32[32,1], index: 4, kind: input, shape index: {}]   ;;  %s581_s6 = inlined_call_operand.<no memory space> [shape: f32[1,1], index: 6, kind: input, shape index: {}]   ;;  %s582_s5 = inlined_call_operand.vmem [shape: f32[32,1], index: 5, kind: input, shape index: {}]   ;;  %s583_s1 = inlined_call_operand.vmem [shape: bf16[64,26], index: 1, kind: input, shape index: {}]   ;;  %s584_s3 = inlined_call_operand.vmem [shape: bf16[32,64], index: 3, kind: input, shape index: {}]   ;;  %s585_s7 = inlined_call_operand.vmem [shape: f32[1,128], index: 7, kind: output, shape index: {}]  }
   0x1   :  { %v43_v0 = vld [vmem:[%s578_s0 + $0x70] sm:$0xff]  ;;  %v44_v1 = vld [vmem:[%s578_s0 + $0x78] sm:$0xff]  ;;  %v41_v3 = vld [vmem:[%s578_s0 + $0x60] sm:$0xff]  ;;  %398 = vset.pattern.permute.xlu0 %v405_v16  ;;  %399 = vset.pattern.permute.xlu1 %v405_v16  ;;  %v12_v39 = vstv %s581_s6 }
   0x2   :  { %v52_v2 = vpack.c.bf16 %v44_v1, %v43_v0  ;;  %v42_v4 = vld [vmem:[%s578_s0 + $0x68] sm:$0xff]  ;;  %v39_v8 = vld [vmem:[%s578_s0 + $0x50] sm:$0xff]  ;;  %v40_v9 = vld [vmem:[%s578_s0 + $0x58] sm:$0xff]  ;;  %400 = vset.pattern.permute.xlu2 %v405_v16  ;;  %13 = vst [vmem:[#allocation2] sm:$0x1] %v12_v39 }
   0x3   :  { %v51_v6 = vpack.c.bf16 %v42_v4, %v41_v3  ;;  %v50_v10 = vpack.c.bf16 %v40_v9, %v39_v8  ;;  %v37_v12 = vld [vmem:[%s578_s0 + $0x40] sm:$0xff]  ;;  %v38_v13 = vld [vmem:[%s578_s0 + $0x48] sm:$0xff]  ;;  %v67_v14 = vld [vmem:[%s579_s2 + $0x30] sm:$0xff] }
   0x4   :  { %v164_v5 = vsel %vm129_vm0, %v52_v2, 0  ;;  %v49_v15 = vpack.c.bf16 %v38_v13, %v37_v12  ;;  %101 = vperm.xlu0 %398, %v67_v14   ;;  %v35_v18 = vld [vmem:[%s578_s0 + $0x30] sm:$0xff]  ;;  %v36_v19 = vld [vmem:[%s578_s0 + $0x38] sm:$0xff]  ;;  %v65_v20 = vld [vmem:[%s579_s2 + $0x20] sm:$0xff] }
   0x5   :  { %382 = vmatpush.bf16.xpose.msra.mxu3 %v164_v5  ;;  %166 = vmatpush.bf16.xpose.msra.mxu0 %v164_v5  ;;  %v161_v7 = vsel %vm129_vm0, %v51_v6, 0  ;;  %v158_v11 = vsel %vm129_vm0, %v50_v10, 0  ;;  %v48_v21 = vpack.c.bf16 %v36_v19, %v35_v18  ;;  %v33_v23 = vld [vmem:[%s578_s0 + $0x20] sm:$0xff]  ;;  %v34_v24 = vld [vmem:[%s578_s0 + $0x28] sm:$0xff]  ;;  %v68_v25 = vld [vmem:[%s579_s2 + $0x38] sm:$0xff] }
   0x6   :  { %381 = vmatpush.bf16.xpose.msra.mxu2 %v164_v5  ;;  %v155_v17 = vsel %vm129_vm0, %v49_v15, 0  ;;  %91 = vperm.xlu1 %399, %v65_v20   ;;  %v66_v26 = vld [vmem:[%s579_s2 + $0x28] sm:$0xff]  ;;  %v47_v27 = vpack.c.bf16 %v34_v24, %v33_v23  ;;  %v31_v29 = vld [vmem:[%s578_s0 + $0x10] sm:$0xff]  ;;  %v32_v30 = vld [vmem:[%s578_s0 + $0x18] sm:$0xff] }
   0x7   :  { %v152_v22 = vsel %vm129_vm0, %v48_v21, 0  ;;  %v61_v31 = vld [vmem:[%s579_s2] sm:$0xff]  ;;  %v62_v32 = vld [vmem:[%s579_s2 + $0x8] sm:$0xff]  ;;  %v46_v33 = vpack.c.bf16 %v32_v30, %v31_v29  ;;  %v213_v38 = vld [vmem:[%s580_s4 + $0x10] sm:$0xff] }
   0x8   :  { %v149_v28 = vsel %vm129_vm0, %v47_v27, 0  ;;  %v29_v35 = vld [vmem:[%s578_s0] sm:$0xff]  ;;  %v30_v36 = vld [vmem:[%s578_s0 + $0x8] sm:$0xff]  ;;  %v63_v40 = vld [vmem:[%s579_s2 + $0x10] sm:$0xff] }
   0x9   :  { %v146_v34 = vsel %vm129_vm0, %v46_v33, 0  ;;  %v212_v37 = vld [vmem:[%s580_s4 + $0x8] sm:$0xff]  ;;  %v45_v41 = vpack.c.bf16 %v30_v36, %v29_v35  ;;  %81 = vperm.xlu2 %400, %v63_v40   ;;  %v275_v43 = vld [vmem:[%s582_s5] sm:$0xff]  ;;  %v64_v45 = vld [vmem:[%s579_s2 + $0x18] sm:$0xff] }
   0xa   :  { %v276_v44 = vld [vmem:[%s582_s5 + $0x8] sm:$0xff]  ;;  %v377_v46 = vld [vmem:[%s583_s1 + $0x10] sm:$0xff]  ;;  %v375_v47 = vld [vmem:[%s583_s1] sm:$0xff] }
   0xb   :  { %v143_v42 = vsel %vm129_vm0, %v45_v41, 0  ;;  %v376_v48 = vld [vmem:[%s583_s1 + $0x8] sm:$0xff]  ;;  %v278_v49 = vld [vmem:[%s582_s5 + $0x18] sm:$0xff]  ;;  %v312_v50 = vld [vmem:[#allocation2] sm:$0x1] }
   0xc   :  { %106 = vperm.xlu0 %398, %v68_v25   ;;  %v211_v51 = vld [vmem:[%s580_s4] sm:$0xff]  ;;  %v214_v52 = vld [vmem:[%s580_s4 + $0x18] sm:$0xff]  ;;  %v277_v54 = vld [vmem:[%s582_s5 + $0x10] sm:$0xff] }
   0xd   :  { %384 = vmatpush.bf16.xpose.msra.mxu3 %v161_v7  ;;  %167 = vmatpush.bf16.xpose.msra.mxu0 %v161_v7  ;;  %v378_v53 = vld [vmem:[%s583_s1 + $0x18] sm:$0xff]  ;;  %v379_v27 = vld [vmem:[%s584_s3] sm:$0xff] }
   0xe   :  { %383 = vmatpush.bf16.xpose.msra.mxu2 %v161_v7  ;;  %96 = vperm.xlu1 %399, %v66_v26  }
  0x11   :  { %86 = vperm.xlu2 %400, %v64_v45  }
  0x14   :  { %71 = vperm.xlu0 %398, %v61_v31  }
  0x15   :  { %386 = vmatpush.bf16.xpose.msra.mxu3 %v158_v11  ;;  %168 = vmatpush.bf16.xpose.msra.mxu0 %v158_v11 }
  0x16   :  { %385 = vmatpush.bf16.xpose.msra.mxu2 %v158_v11  ;;  %76 = vperm.xlu1 %399, %v62_v32  }
  0x19   :  { %217 = vperm.xlu2 %400, %v211_v51  }
  0x1c   :  { %222 = vperm.xlu0 %398, %v212_v37  }
  0x1d   :  { %388 = vmatpush.bf16.xpose.msra.mxu3 %v155_v17  ;;  %169 = vmatpush.bf16.xpose.msra.mxu0 %v155_v17 }
  0x1e   :  { %387 = vmatpush.bf16.xpose.msra.mxu2 %v155_v17  ;;  %227 = vperm.xlu1 %399, %v213_v38  }
  0x21   :  { %232 = vperm.xlu2 %400, %v214_v52  }
  0x24   :  { %281 = vperm.xlu0 %398, %v275_v43  }
  0x25   :  { %390 = vmatpush.bf16.xpose.msra.mxu3 %v152_v22  ;;  %170 = vmatpush.bf16.xpose.msra.mxu0 %v152_v22 }
  0x26   :  { %389 = vmatpush.bf16.xpose.msra.mxu2 %v152_v22  ;;  %286 = vperm.xlu1 %399, %v276_v44  }
  0x29   :  { %291 = vperm.xlu2 %400, %v277_v54  }
  0x2c   :  { %296 = vperm.xlu0 %398, %v278_v49  }
  0x2d   :  { %392 = vmatpush.bf16.xpose.msra.mxu3 %v149_v28  ;;  %171 = vmatpush.bf16.xpose.msra.mxu0 %v149_v28 }
  0x2e   :  { %391 = vmatpush.bf16.xpose.msra.mxu2 %v149_v28  ;;  %315 = vperm.xlu1 %399, %v312_v50   ;;  %v380_v28 = vld [vmem:[%s584_s3 + $0x8] sm:$0xff] }
  0x35   :  { %394 = vmatpush.bf16.xpose.msra.mxu3 %v146_v34  ;;  %172 = vmatpush.bf16.xpose.msra.mxu0 %v146_v34 }
  0x36   :  { %393 = vmatpush.bf16.xpose.msra.mxu2 %v146_v34 }
  0x3d   :  { %396 = vmatpush.bf16.xpose.msra.mxu3 %v143_v42  ;;  %173 = vmatpush.bf16.xpose.msra.mxu0 %v143_v42 }
  0x3e   :  { %395 = vmatpush.bf16.xpose.msra.mxu2 %v143_v42 }
  0x44   :  { %362 = vmatmul.msk.bf16.vlgmr.msra.gmra.mxu3 %vm129_vm0, %v377_v46  ;;  %360 = vmatmul.msk.bf16.vlgmr.msra.gmra.mxu0 %vm129_vm0, %v375_v47 }
  0x45   :  { %361 = vmatmul.msk.bf16.vlgmr.msra.gmra.mxu2 %vm129_vm0, %v376_v48 }
  0x54   :  { %363 = vmatmul.msk.bf16.gmra.mxu3 %vm129_vm0, %v378_v53 }
  0x63   :  { %v82_v61 = vpop.permute.xlu2 %81 }
  0x6b   :  { %v87_v9 = vpop.permute.xlu2 %86 }
  0x73   :  { %v218_v30 = vpop.permute.xlu2 %217 }
  0x76   :  { %v102_v57 = vpop.permute.xlu0 %101 }
  0x78   :  { %v92_v58 = vpop.permute.xlu1 %91 }
  0x7b   :  { %v233_v34 = vpop.permute.xlu2 %232 }
  0x7e   :  { %v107_v63 = vpop.permute.xlu0 %106 }
  0x80   :  { %v97_v0 = vpop.permute.xlu1 %96 }
  0x83   :  { %v292_v45 = vpop.permute.xlu2 %291 }
  0x86   :  { %v72_v15 = vpop.permute.xlu0 %71 }
  0x88   :  { %v77_v17 = vpop.permute.xlu1 %76 }
  0x8e   :  { %v223_v31 = vpop.permute.xlu0 %222 }
  0x90   :  { %v228_v33 = vpop.permute.xlu1 %227 }
  0x96   :  { %v282_v39 = vpop.permute.xlu0 %281 }
  0x98   :  { %v287_v43 = vpop.permute.xlu1 %286 }
  0x9e   :  { %v297_v52 = vpop.permute.xlu0 %296 }
  0xc1   :  { %v175_v62 = vpop.f32.mrf.mxu0 }
  0xc2   :  { %v176_v18 = vadd.f32 %v175_v62, %v72_v15 }
  0xc4   :  { %v195_v23 = vmax.f32 %v176_v18, 0.0 }
  0xc7   :  { %v185_v55 = vpop.f32.mrf.mxu3 }
  0xc8   :  { %v180_v59 = vpop.f32.mrf.mxu2  ;;  %v186_v6 = vadd.f32 %v185_v55, %v92_v58 }
  0xc9   :  { %v181_v11 = vadd.f32 %v180_v59, %v82_v61  ;;  %v177_v14 = vpop.f32.mrf.mxu0 }
  0xca   :  { %v199_v16 = vmax.f32 %v186_v6, 0.0  ;;  %v178_v19 = vadd.f32 %v177_v14, %v77_v17 }
  0xcb   :  { %v197_v20 = vmax.f32 %v181_v11, 0.0 }
  0xcc   :  { %v196_v24 = vmax.f32 %v178_v19, 0.0 }
  0xce   :  { %v203_v26 = vpack.c.bf16 %v196_v24, %v195_v23 }
  0xcf   :  { %v187_v56 = vpop.f32.mrf.mxu3 }
  0xd0   :  { %v188_v3 = vadd.f32 %v187_v56, %v97_v0  ;;  %v182_v5 = vpop.f32.mrf.mxu2 }
  0xd1   :  { %v183_v12 = vadd.f32 %v182_v5, %v87_v9 }
  0xd2   :  { %v200_v10 = vmax.f32 %v188_v3, 0.0 }
  0xd3   :  { %v198_v21 = vmax.f32 %v183_v12, 0.0 }
  0xd4   :  { %v205_v22 = vpack.c.bf16 %v200_v10, %v199_v16 }
  0xd5   :  { %v204_v25 = vpack.c.bf16 %v198_v21, %v197_v20 }
  0xd7   :  { %v190_v60 = vpop.f32.mrf.mxu3 }
  0xd8   :  { %v191_v1 = vadd.f32 %v190_v60, %v102_v57  ;;  %v316_v60 = vpop.permute.xlu1 %315 }
  0xd9   :  { %v318_v62 = vperm.slane %v316_v60, 0 }
  0xda   :  { %v201_v7 = vmax.f32 %v191_v1, 0.0 }
  0xdf   :  { %v192_v2 = vpop.f32.mrf.mxu3 }
  0xe0   :  { %v193_v4 = vadd.f32 %v192_v2, %v107_v63 }
  0xe2   :  { %v202_v8 = vmax.f32 %v193_v4, 0.0 }
  0xe4   :  { %v206_v13 = vpack.c.bf16 %v202_v8, %v201_v7 }
  0xe6   :  { %256 = vmatpush.bf16.msra.mxu1 %v206_v13 }
  0xea   :  { %257 = vmatpush.bf16.msra.mxu1 %v205_v22 }
  0xee   :  { %258 = vmatpush.bf16.msra.mxu1 %v204_v25 }
  0xf2   :  { %259 = vmatpush.bf16.msra.mxu1 %v203_v26 }
  0xf5   :  { %372 = vmatmul.msk.bf16.vlgmr.msra.gmra.mxu1 %vm245_vm1, %v379_v27 }
 0x105   :  { %373 = vmatmul.msk.bf16.gmra.mxu1 %vm245_vm1, %v380_v28 }
 0x172   :  { %v261_v29 = vpop.f32.mrf.mxu1 }
 0x173   :  { %v262_v37 = vadd.f32 %v261_v29, %v218_v30 }
 0x175   :  { %v271_v41 = vmax.f32 %v262_v37, 0.0 }
 0x177   :  { %v299_v47 = vmul.f32 %v282_v39, %v271_v41 }
 0x17a   :  { %v263_v32 = vpop.f32.mrf.mxu1 }
 0x17b   :  { %v264_v35 = vadd.f32 %v263_v32, %v223_v31 }
 0x17d   :  { %v272_v40 = vmax.f32 %v264_v35, 0.0 }
 0x17f   :  { %v300_v44 = vmul.f32 %v287_v43, %v272_v40 }
 0x181   :  { %v303_v50 = vadd.f32 %v300_v44, %v299_v47 }
 0x182   :  { %v266_v36 = vpop.f32.mrf.mxu1 }
 0x183   :  { %v267_v38 = vadd.f32 %v266_v36, %v228_v33 }
 0x185   :  { %v273_v42 = vmax.f32 %v267_v38, 0.0 }
 0x187   :  { %v301_v48 = vmul.f32 %v292_v45, %v273_v42 }
 0x189   :  { %v304_v53 = vadd.f32 %v303_v50, %v301_v48 }
 0x18a   :  { %v268_v46 = vpop.f32.mrf.mxu1 }
 0x18b   :  { %v269_v49 = vadd.f32 %v268_v46, %v233_v34 }
 0x18d   :  { %v274_v51 = vmax.f32 %v269_v49, 0.0 }
 0x18f   :  { %v302_v54 = vmul.f32 %v297_v52, %v274_v51 }
 0x191   :  { %v305_v55 = vadd.f32 %v304_v53, %v302_v54 }
 0x193   :  { %v306_v56 = vrot.slane %v305_v55, 4 }
 0x195   :  { %v307_v57 = vadd.f32 %v306_v56, %v305_v55 }
 0x197   :  { %v308_v58 = vrot.slane %v307_v57, 2 }
 0x199   :  { %v309_v59 = vadd.f32 %v308_v58, %v307_v57 }
 0x19b   :  { %v310_v61 = vrot.slane %v309_v59, 1 }
 0x19d   :  { %v311_v63 = vadd.f32 %v310_v61, %v309_v59 }
 0x19f   :  { %v319_v0 = vadd.f32 %v318_v62, %v311_v63 }
 0x1a1   :  { %v374_v1 = vmul.f32 -1.442695, %v319_v0 }
 0x1a3   :  { %401 = vpow2.f32 %v374_v1 }
 0x1a9   :  { %v402_v2 = vpop.eup %401 }
 0x1aa   :  { %v323_v3 = vadd.f32 1.0, %v402_v2 }
 0x1ac   :  { %403 = vrcp.f32 %v323_v3  ;;  %v335_v7 = vand.u32 2147483648, %v323_v3  ;;  %v333_v9 = vand.u32 2147483647, %v323_v3  ;;  %vm329_vm3 = vweird.f32 %v323_v3 }
 0x1ae   :  { %v336_v11 = vor.u32 1.1754944e-38, %v335_v7  ;;  %vm334_vm5 = vcmp.eq.f32.partialorder %v333_v9, 8.507059e+37 }
 0x1b2   :  { %v404_v4 = vpop.eup %403 }
 0x1b3   :  { %v325_v5 = vmul.f32 %v404_v4, %v323_v3  ;;  %vm330_vm2 = vweird.f32 %v404_v4 }
 0x1b4   :  { %vm331_vm4 = vmor %vm329_vm3, %vm330_vm2 }
 0x1b5   :  { %v326_v6 = vsub.f32 1.0, %v325_v5 }
 0x1b7   :  { %v327_v8 = vmul.f32 %v404_v4, %v326_v6 }
 0x1b9   :  { %v328_v10 = vadd.f32 %v404_v4, %v327_v8 }
 0x1bb   :  { %v332_v12 = vsel %vm331_vm4, %v404_v4, %v328_v10 }
 0x1bc   :  { %v337_v13 = vsel %vm334_vm5, %v336_v11, %v332_v12 }
 0x1bd   :  { %339 = vst [vmem:[%s585_s7] sm:$0x1] %v337_v13 }

</bundles_post_ra>
